<compile_context>
chip_gen: v5e
topology: v5e:2x2
jax: 0.10.0
libtpu: 0.0.40
codegen_flags: <defaults>
</compile_context>

<pallas_src>
import functools

import jax
import jax.numpy as jnp
from jax import lax
from jax.experimental import pallas as pl
from jax.experimental.pallas import tpu as pltpu


def binctabl_kernel(dims,
                    x_ref,      # (Bb, d1*t1)      f32  batch rows, flat (d,t) on lanes
                    st_ref,     # (d1*t1, d1+t1)   f32  stats indicator (sum over d1 / t1)
                    bc_ref,     # (d1+t1, d1*t1)   f32  broadcast indicator (stats -> flat)
                    brow_ref,   # (4, d1+t1)       f32  [1/n, 1/(n-1), var-threshold, gain]
                    b0_ref,     # (1, d1*t1)       f32  BiN bias  y1*B1[t] + y2*B2[j]
                    k1_ref,     # (d1*t1, d2*t2)   bf16 kron(W1a, W2a^T)^T
                    b1_ref,     # (1, d2*t2)       f32  Ba (flattened, row-major)
                    k2_ref,     # (d2*t2, d3*t3)   bf16 kron(W1b, W2b^T)^T
                    b2_ref,     # (1, d3*t3)       f32  Bb (flattened)
                    ktin_ref,   # (d4, d3*t3, t3)  bf16 per-head kron(W1t, I)^T
                    kte_ref,    # (d4, d3*t3, t3)  bf16 per-head kron(W1t, W'^T)^T
                    w2t_ref,    # (t3, t4)         f32
                    bt_ref,     # (1, d4*t4)       f32
                    lam_ref,    # (1,)             f32  SMEM scalar
                    out_ref):   # (Bb, d4*t4)      f32
    d1, t1, d2, t2, d3, t3, d4, t4 = dims
    f32 = jnp.float32

    x = x_ref[...]                                                   # (Bb, d1*t1)

    # ---------------- BiN: both normalisations, fully vectorised ----------------
    st = st_ref[...]
    s1 = jnp.dot(x, st, preferred_element_type=f32)                  # (Bb, d1+t1) sums
    s2 = jnp.dot(x * x, st, preferred_element_type=f32)              # sums of squares
    br = brow_ref[...]
    inv_n, inv_nm1, thresh, gain = br[0:1, :], br[1:2, :], br[2:3, :], br[3:4, :]
    mean = s1 * inv_n
    var = (s2 - s1 * mean) * inv_nm1                                 # unbiased variance
    # feature-axis rows: guard only var<=0 (PyTorch has no clamp there);
    # time-axis rows: std<1e-4  <=>  var<1e-8 clamp, as in the PyTorch forward.
    inv_std = jnp.where(var <= thresh, 1.0, lax.rsqrt(var))
    scale_s = gain * inv_std                                         # (Bb, d1+t1)
    shift_s = scale_s * mean
    bc = bc_ref[...]
    scale = jnp.dot(scale_s, bc, preferred_element_type=f32)         # (Bb, d1*t1)
    shift = jnp.dot(shift_s, bc, preferred_element_type=f32)
    xb = x * scale - shift + b0_ref[...]

    # ---------- BL layers: one Kronecker-folded MXU matmul each (bf16 x bf16 -> f32) ----------
    cdt = k1_ref.dtype
    h = jnp.maximum(
        jnp.dot(xb.astype(cdt), k1_ref[...], preferred_element_type=f32) + b1_ref[...],
        0.0)
    h = jnp.maximum(
        jnp.dot(h.astype(cdt), k2_ref[...], preferred_element_type=f32) + b2_ref[...],
        0.0)
    h = h.astype(cdt)

    # ---------------- TABL (per output head, d4 heads) ----------------
    lam = lam_ref[0]
    one_m_lam = 1.0 - lam
    w2t = w2t_ref[...]
    bt = bt_ref[...]
    for i in range(d4):
        xt = jnp.dot(h, ktin_ref[i], preferred_element_type=f32)     # (Bb, t3)
        e = jnp.dot(h, kte_ref[i], preferred_element_type=f32)       # (Bb, t3)
        e = e - jnp.max(e, axis=-1, keepdims=True)
        p = jnp.exp(e)
        att = p * pl.reciprocal(jnp.sum(p, axis=-1, keepdims=True), approx=True)
        xt = xt * (lam + one_m_lam * att)
        y = jnp.dot(xt, w2t, preferred_element_type=f32) + bt[:, i * t4:(i + 1) * t4]
        out_ref[:, i * t4:(i + 1) * t4] = y


def _max_norm(p):
    norm = jnp.sqrt(jnp.sum(p * p))                     # Frobenius norm
    desired = jnp.clip(norm, 0.0, 10.0)
    return p * jnp.where(norm > 10.0, desired / (1e-8 + norm), 1.0)


def binctabl_forward(x, params, block_b=None, mxu_dtype=jnp.bfloat16):
    """x: (B, d1, t1) float32 -> (B, d4) float32 (t4 == 1)."""
    B, d1, t1 = x.shape
    d2, _ = params["W1a"].shape
    _, t2 = params["W2a"].shape
    d3, _ = params["W1b"].shape
    _, t3 = params["W2b"].shape
    d4, _ = params["W1t"].shape
    _, t4 = params["W2t"].shape
    f32 = jnp.float32
    n_in, n_st = d1 * t1, d1 + t1

    # ---- parameter-side mutations of the PyTorch forward (hoisted, once per call) ----
    W1a = _max_norm(params["W1a"]); W2a = _max_norm(params["W2a"])
    W1b = _max_norm(params["W1b"]); W2b = _max_norm(params["W2b"])
    W1t = _max_norm(params["W1t"]); Wt = _max_norm(params["Wt"])
    W2t = _max_norm(params["W2t"])
    y1 = jnp.where(params["y1"] < 0, 0.01, params["y1"]).astype(f32)
    y2 = jnp.where(params["y2"] < 0, 0.01, params["y2"]).astype(f32)
    lam = jnp.clip(params["lam"], 0.0, 1.0).astype(f32).reshape(1)

    # flat feature index (j, t) -> j*t1 + t
    jj, tt = jnp.meshgrid(jnp.arange(d1), jnp.arange(t1), indexing="ij")
    jj = jj.reshape(n_in)
    tt = tt.reshape(n_in)

    # BiN statistics / broadcast indicator matrices:
    #   column c <  t1 : feature-axis stats at time-step c  (sum over the d1 features)
    #   column t1 + c  : time-axis stats for feature c      (sum over the t1 steps)
    S_T = jnp.concatenate(
        [(tt[:, None] == jnp.arange(t1)[None, :]).astype(f32),
         (jj[:, None] == jnp.arange(d1)[None, :]).astype(f32)], axis=1)   # (n_in, n_st)
    Bc = S_T.T                                                            # (n_st, n_in)

    inv_n = jnp.concatenate([jnp.full((t1,), 1.0 / d1, f32),
                             jnp.full((d1,), 1.0 / t1, f32)])
    inv_nm1 = jnp.concatenate([jnp.full((t1,), 1.0 / (d1 - 1), f32),
                               jnp.full((d1,), 1.0 / (t1 - 1), f32)])
    thresh = jnp.concatenate([jnp.zeros((t1,), f32), jnp.full((d1,), 1e-8, f32)])
    gain = jnp.concatenate([y1 * params["l1"].reshape(t1).astype(f32),
                            y2 * params["l2"].reshape(d1).astype(f32)])
    bin_rows = jnp.stack([inv_n, inv_nm1, thresh, gain], axis=0)          # (4, n_st)
    bias0 = (y1 * params["B1"].reshape(t1)[tt]
             + y2 * params["B2"].reshape(d1)[jj]).reshape(1, n_in).astype(f32)

    # Kronecker-folded layer weights (already transposed for batch-rows activations)
    K1T = jnp.kron(W1a, W2a.T).T.astype(mxu_dtype)                        # (d1*t1, d2*t2)
    K2T = jnp.kron(W1b, W2b.T).T.astype(mxu_dtype)                        # (d2*t2, d3*t3)
    ba_row = params["Ba"].reshape(1, d2 * t2).astype(f32)
    bb_row = params["Bb"].reshape(1, d3 * t3).astype(f32)

    eye = jnp.eye(t3, dtype=f32)
    Wp = Wt - Wt * eye + eye / t3                                         # TABL W'
    Ktin_h = (jnp.kron(W1t, eye).T.reshape(d3 * t3, d4, t3)
              .transpose(1, 0, 2).astype(mxu_dtype))                      # (d4, d3*t3, t3)
    Kte_h = (jnp.kron(W1t, Wp.T).T.reshape(d3 * t3, d4, t3)
             .transpose(1, 0, 2).astype(mxu_dtype))                       # (d4, d3*t3, t3)
    W2t_f = W2t.astype(f32)
    bt_row = params["Bt"].reshape(1, d4 * t4).astype(f32)

    # ---- batch blocking: batch rows on sublanes, flat features on lanes ----
    if block_b is None:
        if B <= 128:
            block_b = B        # single exact block
        elif B <= 1024:
            block_b = 128      # >=2 blocks keeps both v7x TCs busy; small tail waste
        else:
            block_b = 512      # amortise per-grid-step overhead on single-TC v5e/v6e
    n_blk = pl.cdiv(B, block_b)

    # Free reshape (contiguous minor dims): no HBM transpose / pad pass before the
    # kernel.  The ragged last block reads unspecified rows; rows never mix in the
    # kernel and its out-of-range output rows are discarded by Pallas.
    x2d = x.reshape(B, n_in).astype(f32)

    dims = (d1, t1, d2, t2, d3, t3, d4, t4)
    kernel = functools.partial(binctabl_kernel, dims)

    out = pl.pallas_call(
        kernel,
        out_shape=jax.ShapeDtypeStruct((B, d4 * t4), f32),
        grid=(n_blk,),
        in_specs=[
            pl.BlockSpec((block_b, n_in), lambda b: (b, 0)),              # x block
            pl.BlockSpec((n_in, n_st), lambda b: (0, 0)),                 # stats indicator
            pl.BlockSpec((n_st, n_in), lambda b: (0, 0)),                 # broadcast indicator
            pl.BlockSpec((4, n_st), lambda b: (0, 0)),                    # BiN row constants
            pl.BlockSpec((1, n_in), lambda b: (0, 0)),                    # BiN bias
            pl.BlockSpec((n_in, d2 * t2), lambda b: (0, 0)),              # K1^T
            pl.BlockSpec((1, d2 * t2), lambda b: (0, 0)),                 # Ba
            pl.BlockSpec((d2 * t2, d3 * t3), lambda b: (0, 0)),           # K2^T
            pl.BlockSpec((1, d3 * t3), lambda b: (0, 0)),                 # Bb
            pl.BlockSpec((d4, d3 * t3, t3), lambda b: (0, 0, 0)),         # per-head Ktin^T
            pl.BlockSpec((d4, d3 * t3, t3), lambda b: (0, 0, 0)),         # per-head Kte^T
            pl.BlockSpec((t3, t4), lambda b: (0, 0)),                     # W2t
            pl.BlockSpec((1, d4 * t4), lambda b: (0, 0)),                 # Bt
            pl.BlockSpec(memory_space=pltpu.MemorySpace.SMEM),            # lambda scalar
        ],
        out_specs=pl.BlockSpec((block_b, d4 * t4), lambda b: (b, 0)),
        compiler_params=pltpu.CompilerParams(
            dimension_semantics=("parallel",)),
    )(x2d, S_T, Bc, bin_rows, bias0, K1T, ba_row, K2T, bb_row,
      Ktin_h, Kte_h, W2t_f, bt_row, lam)

    y = out.reshape(B, d4, t4)
    if t4 == 1:
        y = y[:, :, 0]                                   # torch.squeeze(x, dim=2)
    return y


def reference_forward(x, params):
    """Pure-JAX reference of the same math (correctness sanity check)."""
    B, d1, t1 = x.shape
    W1a = _max_norm(params["W1a"]); W2a = _max_norm(params["W2a"])
    W1b = _max_norm(params["W1b"]); W2b = _max_norm(params["W2b"])
    W1t = _max_norm(params["W1t"]); Wt = _max_norm(params["Wt"])
    W2t = _max_norm(params["W2t"])

    y1 = jnp.where(params["y1"] < 0, 0.01, params["y1"])
    y2 = jnp.where(params["y2"] < 0, 0.01, params["y2"])
    lam = jnp.clip(params["lam"], 0.0, 1.0)

    mean_t = jnp.mean(x, axis=2, keepdims=True)
    std_t = jnp.std(x, axis=2, keepdims=True, ddof=1)
    std_t = jnp.where(std_t < 1e-4, 1.0, std_t)
    Z2 = (x - mean_t) / std_t
    X2 = params["l2"].reshape(1, d1, 1) * Z2 + params["B2"].reshape(1, d1, 1)

    mean_d = jnp.mean(x, axis=1, keepdims=True)
    std_d = jnp.std(x, axis=1, keepdims=True, ddof=1)
    Z1 = (x - mean_d) / std_d
    X1 = params["l1"].reshape(1, 1, t1) * Z1 + params["B1"].reshape(1, 1, t1)
    xb = y1 * X1 + y2 * X2

    h = jax.nn.relu(jnp.einsum("ij,bjt->bit", W1a, xb) @ W2a + params["Ba"])
    h = jax.nn.relu(jnp.einsum("ij,bjt->bit", W1b, h) @ W2b + params["Bb"])
    Xt = jnp.einsum("ij,bjt->bit", W1t, h)
    t3 = Wt.shape[0]
    eye = jnp.eye(t3, dtype=jnp.float32)
    Wp = Wt - Wt * eye + eye / t3
    E = Xt @ Wp
    A = jax.nn.softmax(E, axis=-1)
    Xt = lam * Xt + (1.0 - lam) * Xt * A
    y = Xt @ W2t + params["Bt"]
    return y[:, :, 0]


def init_params(key, d2, d1, t1, t2, d3, t3, d4, t4):
    ks = jax.random.split(key, 8)
    f32 = jnp.float32
    return {
        # BiN
        "B1": jnp.zeros((t1, 1), f32),
        "l1": 0.3 * jax.random.normal(ks[0], (t1, 1), f32),
        "B2": jnp.zeros((d1, 1), f32),
        "l2": 0.3 * jax.random.normal(ks[1], (d1, 1), f32),
        "y1": jnp.float32(0.5),
        "y2": jnp.float32(0.5),
        # BL
        "W1a": 0.2 * jax.random.normal(ks[2], (d2, d1), f32),
        "W2a": 0.2 * jax.random.normal(ks[3], (t1, t2), f32),
        "Ba": jnp.zeros((d2, t2), f32),
        # BL2
        "W1b": 0.2 * jax.random.normal(ks[4], (d3, d2), f32),
        "W2b": 0.2 * jax.random.normal(ks[5], (t2, t3), f32),
        "Bb": jnp.zeros((d3, t3), f32),
        # TABL
        "W1t": 0.2 * jax.random.normal(ks[6], (d4, d3), f32),
        "Wt": jnp.full((t3, t3), 1.0 / t3, f32),
        "W2t": 0.2 * jax.random.normal(ks[7], (t3, t4), f32),
        "Bt": jnp.zeros((d4, t4), f32),
        "lam": jnp.float32(0.5),
    }


if __name__ == "__main__":
    # Shapes consistent with m_bin_ctabl(d2, d1, t1, t2, d3, t3, d4, t4)
    d2, d1, t1, t2, d3, t3, d4, t4 = 16, 8, 16, 8, 16, 8, 3, 1

    key = jax.random.PRNGKey(0)
    kp, kx1, kx2 = jax.random.split(key, 3)
    params = init_params(kp, d2, d1, t1, t2, d3, t3, d4, t4)

    fwd = jax.jit(binctabl_forward)

    # small batch (single exact block) and a larger batch (multi-block + ragged tail)
    for B, kx in ((2, kx1), (300, kx2)):
        x = jax.random.normal(kx, (B, d1, t1), jnp.float32)
        out = jax.block_until_ready(fwd(x, params))
        ref = jax.block_until_ready(reference_forward(x, params))
        assert out.shape == (B, d4), out.shape
        assert bool(jnp.all(jnp.isfinite(out)))
        # bf16 MXU operands => slightly looser-than-f32 tolerance
        assert jnp.allclose(out, ref, rtol=2e-2, atol=1e-2), (
            "max abs err", float(jnp.max(jnp.abs(out - ref))))

    print("KERNEL_OK")
</pallas_src>

<mosaic_0001>
module attributes {stable_mosaic.version = 11 : i64} {
  func.func @binctabl_kernel(%arg0: i32, %arg1: memref<2x128xf32, #tpu.memory_space<vmem>>, %arg2: memref<128x24xf32, #tpu.memory_space<vmem>>, %arg3: memref<24x128xf32, #tpu.memory_space<vmem>>, %arg4: memref<4x24xf32, #tpu.memory_space<vmem>>, %arg5: memref<1x128xf32, #tpu.memory_space<vmem>>, %arg6: memref<128x128xbf16, #tpu.memory_space<vmem>>, %arg7: memref<1x128xf32, #tpu.memory_space<vmem>>, %arg8: memref<128x128xbf16, #tpu.memory_space<vmem>>, %arg9: memref<1x128xf32, #tpu.memory_space<vmem>>, %arg10: memref<3x128x8xbf16, #tpu.memory_space<vmem>>, %arg11: memref<3x128x8xbf16, #tpu.memory_space<vmem>>, %arg12: memref<8x1xf32, #tpu.memory_space<vmem>>, %arg13: memref<1x3xf32, #tpu.memory_space<vmem>>, %arg14: memref<1xf32, #tpu.memory_space<smem>>, %arg15: memref<2x3xf32, #tpu.memory_space<vmem>>) attributes {dimension_semantics = [#tpu.dimension_semantics<parallel>], iteration_bounds = array<i64: 1>, scalar_prefetch = 0 : i64, scratch_operands = 0 : i64, tpu.core_type = #tpu.core_type<tc>, window_params = [{transform_indices = @transform_0, window_bounds = array<i64: 2, 128>}, {pipeline_mode = #tpu.pipeline_mode<synchronous>, transform_indices = @transform_1, window_bounds = array<i64: 128, 24>}, {pipeline_mode = #tpu.pipeline_mode<synchronous>, transform_indices = @transform_2, window_bounds = array<i64: 24, 128>}, {pipeline_mode = #tpu.pipeline_mode<synchronous>, transform_indices = @transform_3, window_bounds = array<i64: 4, 24>}, {pipeline_mode = #tpu.pipeline_mode<synchronous>, transform_indices = @transform_4, window_bounds = array<i64: 1, 128>}, {pipeline_mode = #tpu.pipeline_mode<synchronous>, transform_indices = @transform_5, window_bounds = array<i64: 128, 128>}, {pipeline_mode = #tpu.pipeline_mode<synchronous>, transform_indices = @transform_6, window_bounds = array<i64: 1, 128>}, {pipeline_mode = #tpu.pipeline_mode<synchronous>, transform_indices = @transform_7, window_bounds = array<i64: 128, 128>}, {pipeline_mode = #tpu.pipeline_mode<synchronous>, transform_indices = @transform_8, window_bounds = array<i64: 1, 128>}, {pipeline_mode = #tpu.pipeline_mode<synchronous>, transform_indices = @transform_9, window_bounds = array<i64: 3, 128, 8>}, {pipeline_mode = #tpu.pipeline_mode<synchronous>, transform_indices = @transform_10, window_bounds = array<i64: 3, 128, 8>}, {pipeline_mode = #tpu.pipeline_mode<synchronous>, transform_indices = @transform_11, window_bounds = array<i64: 8, 1>}, {pipeline_mode = #tpu.pipeline_mode<synchronous>, transform_indices = @transform_12, window_bounds = array<i64: 1, 3>}, {transform_indices = @transform_13, window_bounds = array<i64: 1>}, {transform_indices = @transform_14, window_bounds = array<i64: 2, 3>}]} {
    %c0 = arith.constant 0 : index
    %c0_0 = arith.constant 0 : index
    %0 = vector.load %arg1[%c0, %c0_0] : memref<2x128xf32, #tpu.memory_space<vmem>>, vector<2x128xf32>
    %c0_1 = arith.constant 0 : index
    %c0_2 = arith.constant 0 : index
    %1 = vector.load %arg2[%c0_1, %c0_2] : memref<128x24xf32, #tpu.memory_space<vmem>>, vector<128x24xf32>
    %cst = arith.constant dense<0.000000e+00> : vector<2x24xf32>
    %2 = tpu.matmul %0, %1, %cst {dimension_numbers = #tpu.dot_dimension_numbers<[1], [0], [0], [1], [0, 0, 1, 1], [], []>} : vector<2x128xf32>, vector<128x24xf32>, vector<2x24xf32> -> vector<2x24xf32>
    %3 = arith.mulf %0, %0 : vector<2x128xf32>
    %cst_3 = arith.constant dense<0.000000e+00> : vector<2x24xf32>
    %4 = tpu.matmul %3, %1, %cst_3 {dimension_numbers = #tpu.dot_dimension_numbers<[1], [0], [0], [1], [0, 0, 1, 1], [], []>} : vector<2x128xf32>, vector<128x24xf32>, vector<2x24xf32> -> vector<2x24xf32>
    %c0_4 = arith.constant 0 : index
    %c0_5 = arith.constant 0 : index
    %5 = vector.load %arg4[%c0_4, %c0_5] : memref<4x24xf32, #tpu.memory_space<vmem>>, vector<4x24xf32>
    %6 = vector.extract_strided_slice %5 {offsets = [0, 0], sizes = [1, 24], strides = [1, 1]} : vector<4x24xf32> to vector<1x24xf32>
    %7 = vector.extract_strided_slice %5 {offsets = [1, 0], sizes = [1, 24], strides = [1, 1]} : vector<4x24xf32> to vector<1x24xf32>
    %8 = vector.extract_strided_slice %5 {offsets = [2, 0], sizes = [1, 24], strides = [1, 1]} : vector<4x24xf32> to vector<1x24xf32>
    %9 = vector.extract_strided_slice %5 {offsets = [3, 0], sizes = [1, 24], strides = [1, 1]} : vector<4x24xf32> to vector<1x24xf32>
    %10 = vector.broadcast %6 : vector<1x24xf32> to vector<2x24xf32>
    %11 = arith.mulf %2, %10 : vector<2x24xf32>
    %12 = arith.mulf %2, %11 : vector<2x24xf32>
    %13 = arith.subf %4, %12 : vector<2x24xf32>
    %14 = vector.broadcast %7 : vector<1x24xf32> to vector<2x24xf32>
    %15 = arith.mulf %13, %14 : vector<2x24xf32>
    %16 = vector.broadcast %8 : vector<1x24xf32> to vector<2x24xf32>
    %17 = arith.cmpf ole, %15, %16 : vector<2x24xf32>
    %18 = math.rsqrt %15 : vector<2x24xf32>
    %cst_6 = arith.constant 1.000000e+00 : f32
    %19 = vector.broadcast %cst_6 : f32 to vector<2x24xf32>
    %20 = arith.select %17, %19, %18 : vector<2x24xi1>, vector<2x24xf32>
    %21 = vector.broadcast %9 : vector<1x24xf32> to vector<2x24xf32>
    %22 = arith.mulf %21, %20 : vector<2x24xf32>
    %23 = arith.mulf %22, %11 : vector<2x24xf32>
    %c0_7 = arith.constant 0 : index
    %c0_8 = arith.constant 0 : index
    %24 = vector.load %arg3[%c0_7, %c0_8] : memref<24x128xf32, #tpu.memory_space<vmem>>, vector<24x128xf32>
    %cst_9 = arith.constant dense<0.000000e+00> : vector<2x128xf32>
    %25 = tpu.matmul %22, %24, %cst_9 {dimension_numbers = #tpu.dot_dimension_numbers<[1], [0], [0], [1], [0, 0, 1, 1], [], []>} : vector<2x24xf32>, vector<24x128xf32>, vector<2x128xf32> -> vector<2x128xf32>
    %cst_10 = arith.constant dense<0.000000e+00> : vector<2x128xf32>
    %26 = tpu.matmul %23, %24, %cst_10 {dimension_numbers = #tpu.dot_dimension_numbers<[1], [0], [0], [1], [0, 0, 1, 1], [], []>} : vector<2x24xf32>, vector<24x128xf32>, vector<2x128xf32> -> vector<2x128xf32>
    %27 = arith.mulf %0, %25 : vector<2x128xf32>
    %28 = arith.subf %27, %26 : vector<2x128xf32>
    %c0_11 = arith.constant 0 : index
    %c0_12 = arith.constant 0 : index
    %29 = vector.load %arg5[%c0_11, %c0_12] : memref<1x128xf32, #tpu.memory_space<vmem>>, vector<1x128xf32>
    %30 = vector.broadcast %29 : vector<1x128xf32> to vector<2x128xf32>
    %31 = arith.addf %28, %30 : vector<2x128xf32>
    %32 = arith.truncf %31 : vector<2x128xf32> to vector<2x128xbf16>
    %c0_13 = arith.constant 0 : index
    %c0_14 = arith.constant 0 : index
    %33 = vector.load %arg6[%c0_13, %c0_14] : memref<128x128xbf16, #tpu.memory_space<vmem>>, vector<128x128xbf16>
    %cst_15 = arith.constant dense<0.000000e+00> : vector<2x128xf32>
    %34 = tpu.matmul %32, %33, %cst_15 {dimension_numbers = #tpu.dot_dimension_numbers<[1], [0], [0], [1], [0, 0, 1, 1], [], []>} : vector<2x128xbf16>, vector<128x128xbf16>, vector<2x128xf32> -> vector<2x128xf32>
    %c0_16 = arith.constant 0 : index
    %c0_17 = arith.constant 0 : index
    %35 = vector.load %arg7[%c0_16, %c0_17] : memref<1x128xf32, #tpu.memory_space<vmem>>, vector<1x128xf32>
    %36 = vector.broadcast %35 : vector<1x128xf32> to vector<2x128xf32>
    %37 = arith.addf %34, %36 : vector<2x128xf32>
    %cst_18 = arith.constant 0.000000e+00 : f32
    %38 = vector.broadcast %cst_18 : f32 to vector<2x128xf32>
    %39 = arith.maximumf %37, %38 : vector<2x128xf32>
    %40 = arith.truncf %39 : vector<2x128xf32> to vector<2x128xbf16>
    %c0_19 = arith.constant 0 : index
    %c0_20 = arith.constant 0 : index
    %41 = vector.load %arg8[%c0_19, %c0_20] : memref<128x128xbf16, #tpu.memory_space<vmem>>, vector<128x128xbf16>
    %cst_21 = arith.constant dense<0.000000e+00> : vector<2x128xf32>
    %42 = tpu.matmul %40, %41, %cst_21 {dimension_numbers = #tpu.dot_dimension_numbers<[1], [0], [0], [1], [0, 0, 1, 1], [], []>} : vector<2x128xbf16>, vector<128x128xbf16>, vector<2x128xf32> -> vector<2x128xf32>
    %c0_22 = arith.constant 0 : index
    %c0_23 = arith.constant 0 : index
    %43 = vector.load %arg9[%c0_22, %c0_23] : memref<1x128xf32, #tpu.memory_space<vmem>>, vector<1x128xf32>
    %44 = vector.broadcast %43 : vector<1x128xf32> to vector<2x128xf32>
    %45 = arith.addf %42, %44 : vector<2x128xf32>
    %cst_24 = arith.constant 0.000000e+00 : f32
    %46 = vector.broadcast %cst_24 : f32 to vector<2x128xf32>
    %47 = arith.maximumf %45, %46 : vector<2x128xf32>
    %48 = arith.truncf %47 : vector<2x128xf32> to vector<2x128xbf16>
    %c0_25 = arith.constant 0 : index
    %49 = memref.load %arg14[%c0_25] : memref<1xf32, #tpu.memory_space<smem>>
    %cst_26 = arith.constant 1.000000e+00 : f32
    %50 = arith.subf %cst_26, %49 : f32
    %c0_27 = arith.constant 0 : index
    %c0_28 = arith.constant 0 : index
    %51 = vector.load %arg12[%c0_27, %c0_28] : memref<8x1xf32, #tpu.memory_space<vmem>>, vector<8x1xf32>
    %c0_29 = arith.constant 0 : index
    %c0_30 = arith.constant 0 : index
    %52 = vector.load %arg13[%c0_29, %c0_30] : memref<1x3xf32, #tpu.memory_space<vmem>>, vector<1x3xf32>
    %c0_31 = arith.constant 0 : index
    %c0_32 = arith.constant 0 : index
    %c0_33 = arith.constant 0 : index
    %53 = vector.load %arg10[%c0_31, %c0_32, %c0_33] : memref<3x128x8xbf16, #tpu.memory_space<vmem>>, vector<1x128x8xbf16>
    %54 = vector.shape_cast %53 : vector<1x128x8xbf16> to vector<128x8xbf16>
    %cst_34 = arith.constant dense<0.000000e+00> : vector<2x8xf32>
    %55 = tpu.matmul %48, %54, %cst_34 {dimension_numbers = #tpu.dot_dimension_numbers<[1], [0], [0], [1], [0, 0, 1, 1], [], []>} : vector<2x128xbf16>, vector<128x8xbf16>, vector<2x8xf32> -> vector<2x8xf32>
    %c0_35 = arith.constant 0 : index
    %c0_36 = arith.constant 0 : index
    %c0_37 = arith.constant 0 : index
    %56 = vector.load %arg11[%c0_35, %c0_36, %c0_37] : memref<3x128x8xbf16, #tpu.memory_space<vmem>>, vector<1x128x8xbf16>
    %57 = vector.shape_cast %56 : vector<1x128x8xbf16> to vector<128x8xbf16>
    %cst_38 = arith.constant dense<0.000000e+00> : vector<2x8xf32>
    %58 = tpu.matmul %48, %57, %cst_38 {dimension_numbers = #tpu.dot_dimension_numbers<[1], [0], [0], [1], [0, 0, 1, 1], [], []>} : vector<2x128xbf16>, vector<128x8xbf16>, vector<2x8xf32> -> vector<2x8xf32>
    %cst_39 = arith.constant dense<0xFF800000> : vector<2xf32>
    %59 = vector.multi_reduction <maximumf>, %58, %cst_39 [1] : vector<2x8xf32> to vector<2xf32>
    %60 = vector.shape_cast %59 : vector<2xf32> to vector<2x1xf32>
    %61 = vector.broadcast %60 : vector<2x1xf32> to vector<2x8xf32>
    %62 = arith.subf %58, %61 : vector<2x8xf32>
    %63 = math.exp %62 : vector<2x8xf32>
    %cst_40 = arith.constant dense<0.000000e+00> : vector<2xf32>
    %64 = vector.multi_reduction <add>, %63, %cst_40 [1] : vector<2x8xf32> to vector<2xf32>
    %65 = vector.shape_cast %64 : vector<2xf32> to vector<2x1xf32>
    %66 = tpu.reciprocal %65 {approx = true} : vector<2x1xf32> -> vector<2x1xf32>
    %67 = vector.broadcast %66 : vector<2x1xf32> to vector<2x8xf32>
    %68 = arith.mulf %63, %67 : vector<2x8xf32>
    %69 = vector.broadcast %50 : f32 to vector<2x8xf32>
    %70 = arith.mulf %69, %68 : vector<2x8xf32>
    %71 = vector.broadcast %49 : f32 to vector<2x8xf32>
    %72 = arith.addf %71, %70 : vector<2x8xf32>
    %73 = arith.mulf %55, %72 : vector<2x8xf32>
    %cst_41 = arith.constant dense<0.000000e+00> : vector<2x1xf32>
    %74 = tpu.matmul %73, %51, %cst_41 {dimension_numbers = #tpu.dot_dimension_numbers<[1], [0], [0], [1], [0, 0, 1, 1], [], []>} : vector<2x8xf32>, vector<8x1xf32>, vector<2x1xf32> -> vector<2x1xf32>
    %75 = vector.extract_strided_slice %52 {offsets = [0, 0], sizes = [1, 1], strides = [1, 1]} : vector<1x3xf32> to vector<1x1xf32>
    %76 = vector.broadcast %75 : vector<1x1xf32> to vector<2x1xf32>
    %77 = arith.addf %74, %76 : vector<2x1xf32>
    %c0_42 = arith.constant 0 : index
    %c0_43 = arith.constant 0 : index
    %78 = vector.load %arg15[%c0_42, %c0_43] : memref<2x3xf32, #tpu.memory_space<vmem>>, vector<2x1xf32>
    tpu.vector_store %arg15[%c0_42, %c0_43], %77 {strides = array<i32>} : memref<2x3xf32, #tpu.memory_space<vmem>>, vector<2x1xf32>,
    %c1 = arith.constant 1 : index
    %c0_44 = arith.constant 0 : index
    %c0_45 = arith.constant 0 : index
    %79 = vector.load %arg10[%c1, %c0_44, %c0_45] : memref<3x128x8xbf16, #tpu.memory_space<vmem>>, vector<1x128x8xbf16>
    %80 = vector.shape_cast %79 : vector<1x128x8xbf16> to vector<128x8xbf16>
    %cst_46 = arith.constant dense<0.000000e+00> : vector<2x8xf32>
    %81 = tpu.matmul %48, %80, %cst_46 {dimension_numbers = #tpu.dot_dimension_numbers<[1], [0], [0], [1], [0, 0, 1, 1], [], []>} : vector<2x128xbf16>, vector<128x8xbf16>, vector<2x8xf32> -> vector<2x8xf32>
    %c1_47 = arith.constant 1 : index
    %c0_48 = arith.constant 0 : index
    %c0_49 = arith.constant 0 : index
    %82 = vector.load %arg11[%c1_47, %c0_48, %c0_49] : memref<3x128x8xbf16, #tpu.memory_space<vmem>>, vector<1x128x8xbf16>
    %83 = vector.shape_cast %82 : vector<1x128x8xbf16> to vector<128x8xbf16>
    %cst_50 = arith.constant dense<0.000000e+00> : vector<2x8xf32>
    %84 = tpu.matmul %48, %83, %cst_50 {dimension_numbers = #tpu.dot_dimension_numbers<[1], [0], [0], [1], [0, 0, 1, 1], [], []>} : vector<2x128xbf16>, vector<128x8xbf16>, vector<2x8xf32> -> vector<2x8xf32>
    %cst_51 = arith.constant dense<0xFF800000> : vector<2xf32>
    %85 = vector.multi_reduction <maximumf>, %84, %cst_51 [1] : vector<2x8xf32> to vector<2xf32>
    %86 = vector.shape_cast %85 : vector<2xf32> to vector<2x1xf32>
    %87 = vector.broadcast %86 : vector<2x1xf32> to vector<2x8xf32>
    %88 = arith.subf %84, %87 : vector<2x8xf32>
    %89 = math.exp %88 : vector<2x8xf32>
    %cst_52 = arith.constant dense<0.000000e+00> : vector<2xf32>
    %90 = vector.multi_reduction <add>, %89, %cst_52 [1] : vector<2x8xf32> to vector<2xf32>
    %91 = vector.shape_cast %90 : vector<2xf32> to vector<2x1xf32>
    %92 = tpu.reciprocal %91 {approx = true} : vector<2x1xf32> -> vector<2x1xf32>
    %93 = vector.broadcast %92 : vector<2x1xf32> to vector<2x8xf32>
    %94 = arith.mulf %89, %93 : vector<2x8xf32>
    %95 = vector.broadcast %50 : f32 to vector<2x8xf32>
    %96 = arith.mulf %95, %94 : vector<2x8xf32>
    %97 = vector.broadcast %49 : f32 to vector<2x8xf32>
    %98 = arith.addf %97, %96 : vector<2x8xf32>
    %99 = arith.mulf %81, %98 : vector<2x8xf32>
    %cst_53 = arith.constant dense<0.000000e+00> : vector<2x1xf32>
    %100 = tpu.matmul %99, %51, %cst_53 {dimension_numbers = #tpu.dot_dimension_numbers<[1], [0], [0], [1], [0, 0, 1, 1], [], []>} : vector<2x8xf32>, vector<8x1xf32>, vector<2x1xf32> -> vector<2x1xf32>
    %101 = vector.extract_strided_slice %52 {offsets = [0, 1], sizes = [1, 1], strides = [1, 1]} : vector<1x3xf32> to vector<1x1xf32>
    %102 = vector.broadcast %101 : vector<1x1xf32> to vector<2x1xf32>
    %103 = arith.addf %100, %102 : vector<2x1xf32>
    %c0_54 = arith.constant 0 : index
    %c1_55 = arith.constant 1 : index
    %104 = vector.load %arg15[%c0_54, %c1_55] : memref<2x3xf32, #tpu.memory_space<vmem>>, vector<2x1xf32>
    tpu.vector_store %arg15[%c0_54, %c1_55], %103 {strides = array<i32>} : memref<2x3xf32, #tpu.memory_space<vmem>>, vector<2x1xf32>,
    %c2 = arith.constant 2 : index
    %c0_56 = arith.constant 0 : index
    %c0_57 = arith.constant 0 : index
    %105 = vector.load %arg10[%c2, %c0_56, %c0_57] : memref<3x128x8xbf16, #tpu.memory_space<vmem>>, vector<1x128x8xbf16>
    %106 = vector.shape_cast %105 : vector<1x128x8xbf16> to vector<128x8xbf16>
    %cst_58 = arith.constant dense<0.000000e+00> : vector<2x8xf32>
    %107 = tpu.matmul %48, %106, %cst_58 {dimension_numbers = #tpu.dot_dimension_numbers<[1], [0], [0], [1], [0, 0, 1, 1], [], []>} : vector<2x128xbf16>, vector<128x8xbf16>, vector<2x8xf32> -> vector<2x8xf32>
    %c2_59 = arith.constant 2 : index
    %c0_60 = arith.constant 0 : index
    %c0_61 = arith.constant 0 : index
    %108 = vector.load %arg11[%c2_59, %c0_60, %c0_61] : memref<3x128x8xbf16, #tpu.memory_space<vmem>>, vector<1x128x8xbf16>
    %109 = vector.shape_cast %108 : vector<1x128x8xbf16> to vector<128x8xbf16>
    %cst_62 = arith.constant dense<0.000000e+00> : vector<2x8xf32>
    %110 = tpu.matmul %48, %109, %cst_62 {dimension_numbers = #tpu.dot_dimension_numbers<[1], [0], [0], [1], [0, 0, 1, 1], [], []>} : vector<2x128xbf16>, vector<128x8xbf16>, vector<2x8xf32> -> vector<2x8xf32>
    %cst_63 = arith.constant dense<0xFF800000> : vector<2xf32>
    %111 = vector.multi_reduction <maximumf>, %110, %cst_63 [1] : vector<2x8xf32> to vector<2xf32>
    %112 = vector.shape_cast %111 : vector<2xf32> to vector<2x1xf32>
    %113 = vector.broadcast %112 : vector<2x1xf32> to vector<2x8xf32>
    %114 = arith.subf %110, %113 : vector<2x8xf32>
    %115 = math.exp %114 : vector<2x8xf32>
    %cst_64 = arith.constant dense<0.000000e+00> : vector<2xf32>
    %116 = vector.multi_reduction <add>, %115, %cst_64 [1] : vector<2x8xf32> to vector<2xf32>
    %117 = vector.shape_cast %116 : vector<2xf32> to vector<2x1xf32>
    %118 = tpu.reciprocal %117 {approx = true} : vector<2x1xf32> -> vector<2x1xf32>
    %119 = vector.broadcast %118 : vector<2x1xf32> to vector<2x8xf32>
    %120 = arith.mulf %115, %119 : vector<2x8xf32>
    %121 = vector.broadcast %50 : f32 to vector<2x8xf32>
    %122 = arith.mulf %121, %120 : vector<2x8xf32>
    %123 = vector.broadcast %49 : f32 to vector<2x8xf32>
    %124 = arith.addf %123, %122 : vector<2x8xf32>
    %125 = arith.mulf %107, %124 : vector<2x8xf32>
    %cst_65 = arith.constant dense<0.000000e+00> : vector<2x1xf32>
    %126 = tpu.matmul %125, %51, %cst_65 {dimension_numbers = #tpu.dot_dimension_numbers<[1], [0], [0], [1], [0, 0, 1, 1], [], []>} : vector<2x8xf32>, vector<8x1xf32>, vector<2x1xf32> -> vector<2x1xf32>
    %127 = vector.extract_strided_slice %52 {offsets = [0, 2], sizes = [1, 1], strides = [1, 1]} : vector<1x3xf32> to vector<1x1xf32>
    %128 = vector.broadcast %127 : vector<1x1xf32> to vector<2x1xf32>
    %129 = arith.addf %126, %128 : vector<2x1xf32>
    %c0_66 = arith.constant 0 : index
    %c2_67 = arith.constant 2 : index
    %130 = vector.load %arg15[%c0_66, %c2_67] : memref<2x3xf32, #tpu.memory_space<vmem>>, vector<2x1xf32>
    tpu.vector_store %arg15[%c0_66, %c2_67], %129 {strides = array<i32>} : memref<2x3xf32, #tpu.memory_space<vmem>>, vector<2x1xf32>,
    return
  }
  func.func @transform_0(%arg0: i32) -> (i32, i32) {
    %c0_i32 = arith.constant 0 : i32
    %c0_i32_0 = arith.constant 0 : i32
    return %arg0, %c0_i32 : i32, i32
  }
  func.func @transform_1(%arg0: i32) -> (i32, i32) {
    %c0_i32 = arith.constant 0 : i32
    %c0_i32_0 = arith.constant 0 : i32
    %c0_i32_1 = arith.constant 0 : i32
    return %c0_i32, %c0_i32_0 : i32, i32
  }
  func.func @transform_2(%arg0: i32) -> (i32, i32) {
    %c0_i32 = arith.constant 0 : i32
    %c0_i32_0 = arith.constant 0 : i32
    %c0_i32_1 = arith.constant 0 : i32
    return %c0_i32, %c0_i32_0 : i32, i32
  }
  func.func @transform_3(%arg0: i32) -> (i32, i32) {
    %c0_i32 = arith.constant 0 : i32
    %c0_i32_0 = arith.constant 0 : i32
    %c0_i32_1 = arith.constant 0 : i32
    return %c0_i32, %c0_i32_0 : i32, i32
  }
  func.func @transform_4(%arg0: i32) -> (i32, i32) {
    %c0_i32 = arith.constant 0 : i32
    %c0_i32_0 = arith.constant 0 : i32
    %c0_i32_1 = arith.constant 0 : i32
    return %c0_i32, %c0_i32_0 : i32, i32
  }
  func.func @transform_5(%arg0: i32) -> (i32, i32) {
    %c0_i32 = arith.constant 0 : i32
    %c0_i32_0 = arith.constant 0 : i32
    %c0_i32_1 = arith.constant 0 : i32
    return %c0_i32, %c0_i32_0 : i32, i32
  }
  func.func @transform_6(%arg0: i32) -> (i32, i32) {
    %c0_i32 = arith.constant 0 : i32
    %c0_i32_0 = arith.constant 0 : i32
    %c0_i32_1 = arith.constant 0 : i32
    return %c0_i32, %c0_i32_0 : i32, i32
  }
  func.func @transform_7(%arg0: i32) -> (i32, i32) {
    %c0_i32 = arith.constant 0 : i32
    %c0_i32_0 = arith.constant 0 : i32
    %c0_i32_1 = arith.constant 0 : i32
    return %c0_i32, %c0_i32_0 : i32, i32
  }
  func.func @transform_8(%arg0: i32) -> (i32, i32) {
    %c0_i32 = arith.constant 0 : i32
    %c0_i32_0 = arith.constant 0 : i32
    %c0_i32_1 = arith.constant 0 : i32
    return %c0_i32, %c0_i32_0 : i32, i32
  }
  func.func @transform_9(%arg0: i32) -> (i32, i32, i32) {
    %c0_i32 = arith.constant 0 : i32
    %c0_i32_0 = arith.constant 0 : i32
    %c0_i32_1 = arith.constant 0 : i32
    %c0_i32_2 = arith.constant 0 : i32
    return %c0_i32, %c0_i32_0, %c0_i32_1 : i32, i32, i32
  }
  func.func @transform_10(%arg0: i32) -> (i32, i32, i32) {
    %c0_i32 = arith.constant 0 : i32
    %c0_i32_0 = arith.constant 0 : i32
    %c0_i32_1 = arith.constant 0 : i32
    %c0_i32_2 = arith.constant 0 : i32
    return %c0_i32, %c0_i32_0, %c0_i32_1 : i32, i32, i32
  }
  func.func @transform_11(%arg0: i32) -> (i32, i32) {
    %c0_i32 = arith.constant 0 : i32
    %c0_i32_0 = arith.constant 0 : i32
    %c0_i32_1 = arith.constant 0 : i32
    return %c0_i32, %c0_i32_0 : i32, i32
  }
  func.func @transform_12(%arg0: i32) -> (i32, i32) {
    %c0_i32 = arith.constant 0 : i32
    %c0_i32_0 = arith.constant 0 : i32
    %c0_i32_1 = arith.constant 0 : i32
    return %c0_i32, %c0_i32_0 : i32, i32
  }
  func.func @transform_13(%arg0: i32) -> i32 {
    %c0_i32 = arith.constant 0 : i32
    %c0_i32_0 = arith.constant 0 : i32
    return %c0_i32 : i32
  }
  func.func @transform_14(%arg0: i32) -> (i32, i32) {
    %c0_i32 = arith.constant 0 : i32
    %c0_i32_0 = arith.constant 0 : i32
    return %arg0, %c0_i32 : i32, i32
  }
}

</mosaic_0001>

<bundles_post_ra>
// kernel: eq.23
= control target key start
LH: loop header
LB: loop body
LE: loop exit
PB: predicated region body
PF: predicated region fallthrough
CT: control target
= control target key end

     0   :  { %s67_s10 = smov 112   ;;  %s68_s11 = smov 80   ;;  %vm3_vm0 = vcmask 130048   ;;  %vm9_vm1 = vcmask 1048448   ;;  %vm15_vm2 = vcmask 917248   ;;  %vm21_vm3 = vcmask 786048   ;;  %s111_s0 = inlined_call_operand.vmem [shape: s32[8,16], index: 0, kind: input, shape index: {}]   ;;  %s112_s1 = inlined_call_operand.vmem [shape: s32[128], index: 1, kind: output, shape index: {}]  }
   0x1   :  { %v53_v0 = vld [vmem:[%s111_s0 + $0x7] sm:$0x1]   ;;  %v55_v1 = vld [vmem:[%s111_s0 + $0x5] sm:$0x1]   ;;  %v57_v2 = vld [vmem:[%s111_s0 + $0x3] sm:$0x1]  }
   0x2   :  { %7 = vrot.lane.b32.xlu0 %v53_v0, %s67_s10  ;;  %19 = vrot.lane.b32.xlu1 %v55_v1, %s68_s11  ;;  %s69_s14 = smov 48   ;;  %v54_v3 = vld [vmem:[%s111_s0 + $0x6] sm:$0x1]   ;;  %v56_v4 = vld [vmem:[%s111_s0 + $0x4] sm:$0x1]   ;;  %s70_s21 = smov 96  }
   0x3   :  { %31 = vrot.lane.b32.xlu2 %v57_v2, %s69_s14  ;;  %v58_v5 = vld [vmem:[%s111_s0 + $0x2] sm:$0x1]   ;;  %s71_s22 = smov 64   ;;  %s72_s23 = smov 32   ;;  %v59_v6 = vld [vmem:[%s111_s0 + $0x1] sm:$0x1]  }
   0x4   :  { %s73_s26 = smov 16   ;;  %v2_v7 = vld [vmem:[%s111_s0] sm:$0x1]   ;;  %vm27_vm4 = vcmask 654848   ;;  %vm33_vm5 = vcmask 523648   ;;  %vm39_vm6 = vcmask 392448  }
   0x5   :  { %4 = vst.msk [vmem:[#allocation0] sm:$0x1] %vm3_vm0, %v2_v7   ;;  %vm45_vm7 = vcmask 261248  }
   0xa   :  { %13 = vrot.lane.b32.xlu0 %v54_v3, %s70_s21  ;;  %25 = vrot.lane.b32.xlu1 %v56_v4, %s71_s22 }
   0xb   :  { %37 = vrot.lane.b32.xlu2 %v58_v5, %s72_s23 }
  0x12   :  { %43 = vrot.lane.b32.xlu0 %v59_v6, %s73_s26 }
  0x5d   :  { %v32_v8 = vpop.permute.xlu2 %31  }
  0x65   :  { %v38_v9 = vpop.permute.xlu2 %37  }
  0x74   :  { %v8_v10 = vpop.permute.xlu0 %7   ;;  %v20_v11 = vpop.permute.xlu1 %19  }
  0x75   :  { %10 = vst.msk [vmem:[#allocation0] sm:$0x1] %vm9_vm1, %v8_v10  }
  0x7c   :  { %v14_v12 = vpop.permute.xlu0 %13   ;;  %v26_v13 = vpop.permute.xlu1 %25  }
  0x7d   :  { %16 = vst.msk [vmem:[#allocation0] sm:$0x1] %vm15_vm2, %v14_v12  }
  0x7e   :  { %22 = vst.msk [vmem:[#allocation0] sm:$0x1] %vm21_vm3, %v20_v11  }
  0x7f   :  { %28 = vst.msk [vmem:[#allocation0] sm:$0x1] %vm27_vm4, %v26_v13  }
  0x80   :  { %34 = vst.msk [vmem:[#allocation0] sm:$0x1] %vm33_vm5, %v32_v8  }
  0x81   :  { %40 = vst.msk [vmem:[#allocation0] sm:$0x1] %vm39_vm6, %v38_v9  }
  0x84   :  { %v44_v14 = vpop.permute.xlu0 %43  }
  0x85   :  { %46 = vst.msk [vmem:[#allocation0] sm:$0x1] %vm45_vm7, %v44_v14  }
  0x8c   :  { %v49_v15 = vld [vmem:[#allocation0] sm:$0x1] }
  0x8d   :  { %52 = vst [vmem:[%s112_s1] sm:$0x1] %v49_v15 }

// kernel: binctabl_forward.1
= control target key start
LH: loop header
LB: loop body
LE: loop exit
PB: predicated region body
PF: predicated region fallthrough
CT: control target
= control target key end

     0   :  { %s1796_s0 = inlined_call_operand.vmem [shape: f32[2,128], index: 0, kind: input, shape index: {}]   ;;  %s1797_s1 = inlined_call_operand.vmem [shape: f32[128,24], index: 1, kind: input, shape index: {}]   ;;  %s1798_s2 = inlined_call_operand.vmem [shape: f32[24,128], index: 2, kind: input, shape index: {}]   ;;  %s1799_s3 = inlined_call_operand.vmem [shape: f32[4,24], index: 3, kind: input, shape index: {}]   ;;  %s1800_s4 = inlined_call_operand.vmem [shape: f32[1,128], index: 4, kind: input, shape index: {}]   ;;  %s1801_s5 = inlined_call_operand.vmem [shape: bf16[128,128], index: 5, kind: input, shape index: {}]   ;;  %s1802_s6 = inlined_call_operand.vmem [shape: f32[1,128], index: 6, kind: input, shape index: {}]   ;;  %s1803_s7 = inlined_call_operand.vmem [shape: bf16[128,128], index: 7, kind: input, shape index: {}]   ;;  %s1804_s8 = inlined_call_operand.vmem [shape: f32[1,128], index: 8, kind: input, shape index: {}]   ;;  %s1805_s9 = inlined_call_operand.vmem [shape: bf16[3,128,8], index: 9, kind: input, shape index: {}]   ;;  %s1806_s10 = inlined_call_operand.vmem [shape: bf16[3,128,8], index: 10, kind: input, shape index: {}]   ;;  %s1807_s11 = inlined_call_operand.vmem [shape: f32[8,1], index: 11, kind: input, shape index: {}]   ;;  %s1808_s12 = inlined_call_operand.vmem [shape: f32[1,3], index: 12, kind: input, shape index: {}]   ;;  %s1809_s13 = inlined_call_operand.<no memory space> [shape: f32[1], index: 13, kind: input, shape index: {}]   ;;  %s1810_s14 = inlined_call_operand.hbm [shape: f32[2,3], index: 14, kind: output, shape index: {}]  }
   0x1   :  { %v65_v0 = vld [vmem:[%s1797_s1 + $0x78] sm:$0xff]  ;;  %v64_v1 = vld [vmem:[%s1797_s1 + $0x70] sm:$0xff]  ;;  %v63_v2 = vld [vmem:[%s1797_s1 + $0x68] sm:$0xff] }
   0x2   :  { %66 = vmatpush.msra.mxu0 %v65_v0  ;;  %87 = vmatpush.msra.mxu1 %v65_v0  ;;  %v62_v3 = vld [vmem:[%s1797_s1 + $0x60] sm:$0xff]  ;;  %v61_v4 = vld [vmem:[%s1797_s1 + $0x58] sm:$0xff] }
   0x4   :  { %67 = vmatpush.msra.mxu0 %v64_v1  ;;  %88 = vmatpush.msra.mxu1 %v64_v1 }
   0x6   :  { %68 = vmatpush.msra.mxu0 %v63_v2  ;;  %89 = vmatpush.msra.mxu1 %v63_v2 }
   0x8   :  { %69 = vmatpush.msra.mxu0 %v62_v3  ;;  %90 = vmatpush.msra.mxu1 %v62_v3 }
   0x9   :  { %20 = vsyncpa [#allocation4], 0  ;;  %v60_v5 = vld [vmem:[%s1797_s1 + $0x50] sm:$0xff]  ;;  %v59_v6 = vld [vmem:[%s1797_s1 + $0x48] sm:$0xff]  ;;  %vm133_vm4 = vcmask 195584   ;;  %vm512_vm5 = vcmask 58368  }
   0xa   :  { %70 = vmatpush.msra.mxu0 %v61_v4  ;;  %91 = vmatpush.msra.mxu1 %v61_v4  ;;  %v58_v7 = vld [vmem:[%s1797_s1 + $0x40] sm:$0xff]  ;;  %v57_v8 = vld [vmem:[%s1797_s1 + $0x38] sm:$0xff]  ;;  %v56_v9 = vld [vmem:[%s1797_s1 + $0x30] sm:$0xff]  ;;  %s355_s19 = ssub.f32 1.0, %s1809_s13  ;;  %vm532_vm6 = vcmask 64512   ;;  %vm556_vm7 = vcmask 1024  }
   0xb   :  { %v55_v10 = vld [vmem:[%s1797_s1 + $0x28] sm:$0xff]  ;;  %v54_v11 = vld [vmem:[%s1797_s1 + $0x20] sm:$0xff]  ;;  %v53_v12 = vld [vmem:[%s1797_s1 + $0x18] sm:$0xff]  ;;  %s1418_s22 = smov 1   ;;  %s1419_s23 = smov 2   ;;  %vm758_vm8 = vcmask 9224  }
   0xc   :  { %71 = vmatpush.msra.mxu0 %v60_v5  ;;  %92 = vmatpush.msra.mxu1 %v60_v5  ;;  %v52_v13 = vld [vmem:[%s1797_s1 + $0x10] sm:$0xff]  ;;  %v51_v14 = vld [vmem:[%s1797_s1 + $0x8] sm:$0xff]  ;;  %v1544_v15 = vld [vmem:[%s1796_s0] sm:$0x3]  ;;  %s1420_s24 = smov [#allocation3]   ;;  %vm960_vm9 = vcmask 17424  }
   0xd   :  { %v50_v16 = vld [vmem:[%s1797_s1] sm:$0xff]  ;;  %v86_v17 = vmul.f32 %v1544_v15, %v1544_v15  ;;  %v132_v18 = vld [vmem:[%s1798_s2 + $0x10] sm:$0xff]  ;;  %v131_v19 = vld [vmem:[%s1798_s2 + $0x8] sm:$0xff] }
   0xe   :  { %72 = vmatpush.msra.mxu0 %v59_v6  ;;  %93 = vmatpush.msra.mxu1 %v59_v6  ;;  %v130_v20 = vld [vmem:[%s1798_s2] sm:$0xff]  ;;  %v1310_v24 = vld [vmem:[%s1801_s5 + $0x38] sm:$0xff]  ;;  %v1309_v27 = vld [vmem:[%s1801_s5 + $0x30] sm:$0xff]  ;;  %s969_s2 = sshll.u32 %s1810_s14, 4  ;;  %s970_s2 = int_to_ptr.hbm [resolvable:$true] %s969_s2 }
   0xf   :  { %150 = vmatpush.msra.mxu2 %v132_v18  ;;  %v107_v21 = vld [vmem:[%s1799_s3] sm:$0xf]  ;;  %v1308_v31 = vld [vmem:[%s1801_s5 + $0x28] sm:$0xff]  ;;  %v1306_v34 = vld [vmem:[%s1801_s5 + $0x18] sm:$0xff] }
  0x10   :  { %73 = vmatpush.msra.mxu0 %v58_v7  ;;  %94 = vmatpush.msra.mxu1 %v58_v7  ;;  %v108_v22 = vperm.slane %v107_v21, 0  ;;  %v112_v29 = vperm.slane %v107_v21, 1  ;;  %v1307_v33 = vld [vmem:[%s1801_s5 + $0x20] sm:$0xff]  ;;  %v114_v39 = vperm.slane %v107_v21, 2  ;;  %v127_v42 = vperm.slane %v107_v21, 3  ;;  %v1305_v47 = vld [vmem:[%s1801_s5 + $0x10] sm:$0xff] }
  0x11   :  { %151 = vmatpush.msra.mxu2 %v131_v19  ;;  %v1304_v48 = vld [vmem:[%s1801_s5 + $0x8] sm:$0xff]  ;;  %v1303_v49 = vld [vmem:[%s1801_s5] sm:$0xff]  ;;  %v1318_v50 = vld [vmem:[%s1803_s7 + $0x38] sm:$0xff] }
  0x12   :  { %74 = vmatpush.msra.mxu0 %v57_v8  ;;  %95 = vmatpush.msra.mxu1 %v57_v8  ;;  %v1317_v51 = vld [vmem:[%s1803_s7 + $0x30] sm:$0xff]  ;;  %v1316_v52 = vld [vmem:[%s1803_s7 + $0x28] sm:$0xff]  ;;  %v1315_v53 = vld [vmem:[%s1803_s7 + $0x20] sm:$0xff] }
  0x13   :  { %152 = vmatpush.msra.mxu2 %v130_v20  ;;  %339 = vmatpush.bf16.msra.mxu3 %v1318_v50  ;;  %v1314_v54 = vld [vmem:[%s1803_s7 + $0x18] sm:$0xff]  ;;  %v1313_v55 = vld [vmem:[%s1803_s7 + $0x10] sm:$0xff]  ;;  %v1372_v58 = vld [vmem:[%s1800_s4] ss:$0 sm:$0xff] }
  0x14   :  { %75 = vmatpush.msra.mxu0 %v56_v9  ;;  %96 = vmatpush.msra.mxu1 %v56_v9  ;;  %v1312_v63 = vld [vmem:[%s1803_s7 + $0x8] sm:$0xff]  ;;  %v1311_v0 = vld [vmem:[%s1803_s7] sm:$0xff]  ;;  %v1334_v1 = vld [vmem:[%s1806_s10 + $0x38] sm:$0xff] }
  0x15   :  { %256 = vmatpush.bf16.msrb.mxu2 %v1310_v24  ;;  %v1342_v2 = vld [vmem:[%s1805_s9 + $0x78] sm:$0xff]  ;;  %v1333_v3 = vld [vmem:[%s1806_s10 + $0x30] sm:$0xff]  ;;  %v1332_v7 = vld [vmem:[%s1806_s10 + $0x28] sm:$0xff] }
  0x16   :  { %76 = vmatpush.msra.mxu0 %v55_v10  ;;  %97 = vmatpush.msra.mxu1 %v55_v10  ;;  %v1341_v4 = vld [vmem:[%s1805_s9 + $0x70] sm:$0xff]  ;;  %v1326_v5 = vld [vmem:[%s1805_s9 + $0x38] sm:$0xff]  ;;  %v1340_v8 = vld [vmem:[%s1805_s9 + $0x68] sm:$0xff] }
  0x17   :  { %340 = vmatpush.bf16.msra.mxu3 %v1317_v51  ;;  %v1325_v6 = vld [vmem:[%s1805_s9 + $0x30] sm:$0xff]  ;;  %v1324_v9 = vld [vmem:[%s1805_s9 + $0x28] sm:$0xff]  ;;  %v1331_v10 = vld [vmem:[%s1806_s10 + $0x20] sm:$0xff] }
  0x18   :  { %77 = vmatpush.msra.mxu0 %v54_v11  ;;  %98 = vmatpush.msra.mxu1 %v54_v11  ;;  %v1339_v11 = vld [vmem:[%s1805_s9 + $0x60] sm:$0xff]  ;;  %v1336_v21 = vld [vmem:[%s1805_s9 + $0x48] sm:$0xff] }
  0x19   :  { %257 = vmatpush.bf16.msrb.mxu2 %v1309_v27  ;;  %v1327_v24 = vld [vmem:[%s1806_s10] sm:$0xff]  ;;  %v1358_v27 = vld [vmem:[%s1805_s9 + $0xb8] sm:$0xff] }
  0x1a   :  { %78 = vmatpush.msra.mxu0 %v53_v12  ;;  %99 = vmatpush.msra.mxu1 %v53_v12  ;;  %v1323_v12 = vld [vmem:[%s1805_s9 + $0x20] sm:$0xff] }
  0x1b   :  { %341 = vmatpush.bf16.msra.mxu3 %v1316_v52 }
  0x1c   :  { %79 = vmatpush.msra.mxu0 %v52_v13  ;;  %100 = vmatpush.msra.mxu1 %v52_v13  ;;  %v1330_v13 = vld [vmem:[%s1806_s10 + $0x18] sm:$0xff] }
  0x1d   :  { %258 = vmatpush.bf16.msrb.mxu2 %v1308_v31 }
  0x1e   :  { %80 = vmatpush.msra.mxu0 %v51_v14  ;;  %101 = vmatpush.msra.mxu1 %v51_v14  ;;  %v1338_v14 = vld [vmem:[%s1805_s9 + $0x58] sm:$0xff] }
  0x1f   :  { %342 = vmatpush.bf16.msra.mxu3 %v1315_v53 }
  0x20   :  { %81 = vmatpush.msra.mxu0 %v50_v16  ;;  %102 = vmatpush.msra.mxu1 %v50_v16  ;;  %v1329_v16 = vld [vmem:[%s1806_s10 + $0x10] sm:$0xff] }
  0x21   :  { %82 = vmatmul.f32.vlgmr.msra.gmra.mxu0 %v1544_v15  ;;  %103 = vmatmul.f32.vlgmr.msra.gmra.mxu1 %v86_v17  ;;  %v1337_v17 = vld [vmem:[%s1805_s9 + $0x50] sm:$0xff] }
  0x22   :  { %173 = vmatpush.msrb.mxu0 %v132_v18  ;;  %259 = vmatpush.bf16.msrb.mxu2 %v1307_v33  ;;  %v1321_v18 = vld [vmem:[%s1805_s9 + $0x10] sm:$0xff]  ;;  %v1320_v33 = vld [vmem:[%s1805_s9 + $0x8] sm:$0xff] }
  0x23   :  { %343 = vmatpush.bf16.msra.mxu3 %v1314_v54  ;;  %499 = vmatpush.bf16.msrb.mxu1 %v1334_v1  ;;  %v1350_v1 = vld [vmem:[%s1806_s10 + $0x78] sm:$0xff] }
  0x24   :  { %174 = vmatpush.msrb.mxu0 %v131_v19  ;;  %v1373_v19 = vld [vmem:[%s1802_s6] ss:$0 sm:$0xff] }
  0x26   :  { %175 = vmatpush.msrb.mxu0 %v130_v20  ;;  %260 = vmatpush.bf16.msrb.mxu2 %v1306_v34  ;;  %v1328_v20 = vld [vmem:[%s1806_s10 + $0x8] sm:$0xff] }
  0x27   :  { %344 = vmatpush.bf16.msra.mxu3 %v1313_v55  ;;  %500 = vmatpush.bf16.msrb.mxu1 %v1333_v3  ;;  %v1356_v34 = vld [vmem:[%s1805_s9 + $0xa8] sm:$0xff] }
  0x28   :  { %422 = vmatpush.bf16.msra.mxu0 %v1326_v5 }
  0x2a   :  { %261 = vmatpush.bf16.msrb.mxu2 %v1305_v47  ;;  %v1374_v47 = vld [vmem:[%s1804_s8] ss:$0 sm:$0xff]  ;;  %s967_s8 = sshll.u32 %s1420_s24, 4  ;;  %s968_s8 = int_to_ptr.vmem [resolvable:$true] %s967_s8 }
  0x2b   :  { %345 = vmatpush.bf16.msra.mxu3 %v1312_v63  ;;  %501 = vmatpush.bf16.msrb.mxu1 %v1332_v7 }
  0x2c   :  { %423 = vmatpush.bf16.msra.mxu0 %v1325_v6 }
  0x2e   :  { %262 = vmatpush.bf16.msrb.mxu2 %v1304_v48 }
  0x2f   :  { %346 = vmatpush.bf16.msra.mxu3 %v1311_v0  ;;  %502 = vmatpush.bf16.msrb.mxu1 %v1331_v10  ;;  %v356_v0 = vld [vmem:[%s1807_s11] sm:$0xff]  ;;  %v1346_v10 = vld [vmem:[%s1806_s10 + $0x58] sm:$0xff] }
  0x30   :  { %424 = vmatpush.bf16.msra.mxu0 %v1324_v9  ;;  %v1347_v9 = vld [vmem:[%s1806_s10 + $0x60] sm:$0xff] }
  0x32   :  { %263 = vmatpush.bf16.msrb.mxu2 %v1303_v49 }
  0x33   :  { %623 = vmatpush.bf16.msrb.mxu3 %v1342_v2  ;;  %503 = vmatpush.bf16.msrb.mxu1 %v1330_v13  ;;  %v1349_v2 = vld [vmem:[%s1806_s10 + $0x70] sm:$0xff]  ;;  %v1343_v13 = vld [vmem:[%s1806_s10 + $0x40] sm:$0xff] }
  0x34   :  { %425 = vmatpush.bf16.msra.mxu0 %v1323_v12  ;;  %v1344_v12 = vld [vmem:[%s1806_s10 + $0x48] sm:$0xff] }
  0x37   :  { %624 = vmatpush.bf16.msrb.mxu3 %v1341_v4  ;;  %504 = vmatpush.bf16.msrb.mxu1 %v1329_v16  ;;  %v524_v16 = vstv %s355_s19 }
  0x3b   :  { %625 = vmatpush.bf16.msrb.mxu3 %v1340_v8  ;;  %505 = vmatpush.bf16.msrb.mxu1 %v1328_v20  ;;  %v1348_v8 = vld [vmem:[%s1806_s10 + $0x68] sm:$0xff] }
  0x3f   :  { %626 = vmatpush.bf16.msrb.mxu3 %v1339_v11  ;;  %506 = vmatpush.bf16.msrb.mxu1 %v1327_v24  ;;  %v1345_v11 = vld [vmem:[%s1806_s10 + $0x50] sm:$0xff] }
  0x43   :  { %627 = vmatpush.bf16.msrb.mxu3 %v1338_v14  ;;  %825 = vmatpush.bf16.msra.mxu1 %v1358_v27 }
  0x47   :  { %628 = vmatpush.bf16.msrb.mxu3 %v1337_v17 }
  0x4b   :  { %629 = vmatpush.bf16.msrb.mxu3 %v1336_v21 }
  0x9e   :  { %v83_v23 = vpop.f32.mrf.mxu0  ;;  %v104_v26 = vpop.f32.mrf.mxu1 }
  0x9f   :  { %v109_v25 = vmul.f32 %v108_v22, %v83_v23 }
  0xa1   :  { %v110_v28 = vmul.f32 %v109_v25, %v83_v23 }
  0xa3   :  { %v111_v30 = vsub.f32 %v104_v26, %v110_v28  ;;  %v1366_v28 = vld [vmem:[%s1806_s10 + $0xb8] sm:$0xff] }
  0xa5   :  { %v113_v32 = vmul.f32 %v112_v29, %v111_v30  ;;  %v1357_v30 = vld [vmem:[%s1805_s9 + $0xb0] sm:$0xff] }
  0xa6   :  { %826 = vmatpush.bf16.msra.mxu1 %v1357_v30 }
  0xa7   :  { %1376 = vrsqrt.f32 %v113_v32  ;;  %vm122_vm1 = vweird.f32 %v113_v32  ;;  %vm115_vm3 = vcmp.le.f32.partialorder %v113_v32, %v114_v39  ;;  %v1354_v39 = vld [vmem:[%s1805_s9 + $0x98] sm:$0xff] }
  0xaa   :  { %827 = vmatpush.bf16.msra.mxu1 %v1356_v34 }
  0xad   :  { %v1377_v35 = vpop.eup %1376 }
  0xae   :  { %v117_v36 = vmul.f32 %v1377_v35, %v113_v32  ;;  %vm123_vm0 = vweird.f32 %v1377_v35  ;;  %v1365_v32 = vld [vmem:[%s1806_s10 + $0xb0] sm:$0xff] }
  0xaf   :  { %vm124_vm2 = vmor %vm122_vm1, %vm123_vm0 }
  0xb0   :  { %v118_v37 = vmul.f32 %v1377_v35, %v117_v36  ;;  %v1319_v36 = vld [vmem:[%s1805_s9] sm:$0xff] }
  0xb2   :  { %v119_v38 = vmul.f32 0.5, %v118_v37  ;;  %v1355_v37 = vld [vmem:[%s1805_s9 + $0xa0] sm:$0xff] }
  0xb3   :  { %828 = vmatpush.bf16.msra.mxu1 %v1355_v37 }
  0xb4   :  { %v120_v40 = vsub.f32 1.5, %v119_v38  ;;  %v1363_v38 = vld [vmem:[%s1806_s10 + $0xa0] sm:$0xff] }
  0xb6   :  { %v121_v41 = vmul.f32 %v1377_v35, %v120_v40  ;;  %v1362_v40 = vld [vmem:[%s1806_s10 + $0x98] sm:$0xff] }
  0xb7   :  { %829 = vmatpush.bf16.msra.mxu1 %v1354_v39 }
  0xb8   :  { %v125_v43 = vsel %vm124_vm2, %v1377_v35, %v121_v41  ;;  %v1364_v35 = vld [vmem:[%s1806_s10 + $0xa8] sm:$0xff]  ;;  %v1353_v41 = vld [vmem:[%s1805_s9 + $0x90] sm:$0xff] }
  0xb9   :  { %v126_v44 = vsel %vm115_vm3, 1.0, %v125_v43  ;;  %v1352_v43 = vld [vmem:[%s1805_s9 + $0x88] sm:$0xff] }
  0xba   :  { %v128_v45 = vmul.f32 %v127_v42, %v126_v44  ;;  %v1361_v42 = vld [vmem:[%s1806_s10 + $0x90] sm:$0xff]  ;;  %v1360_v44 = vld [vmem:[%s1806_s10 + $0x88] sm:$0xff] }
  0xbb   :  { %830 = vmatpush.bf16.msra.mxu1 %v1353_v41 }
  0xbc   :  { %v129_v46 = vmul.f32 %v128_v45, %v109_v25  ;;  %978 = vmatmul.msk.f32.vlgmr.msra.gmra.mxu2 %vm133_vm4, %v128_v45  ;;  %v1335_v25 = vld [vmem:[%s1805_s9 + $0x40] sm:$0xff] }
  0xbd   :  { %630 = vmatpush.bf16.msrb.mxu3 %v1335_v25  ;;  %v1351_v45 = vld [vmem:[%s1805_s9 + $0x80] sm:$0xff]  ;;  %551 = vmatpush.msra.mxu2 %v356_v0 }
  0xbe   :  { %979 = vmatmul.msk.f32.vlgmr.msrb.gmra.mxu0 %vm133_vm4, %v129_v46  ;;  %v1359_v46 = vld [vmem:[%s1806_s10 + $0x80] sm:$0xff] }
  0xbf   :  { %831 = vmatpush.bf16.msra.mxu1 %v1352_v43 }
  0xc3   :  { %832 = vmatpush.bf16.msra.mxu1 %v1351_v45 }
 0x13b   :  { %v177_v59 = vpop.f32.mrf.mxu0 }
 0x13f   :  { %v154_v56 = vpop.f32.mrf.mxu2 }
 0x140   :  { %v180_v57 = vmul.f32 %v154_v56, %v1544_v15  ;;  %v1322_v15 = vld [vmem:[%s1805_s9 + $0x18] sm:$0xff] }
 0x141   :  { %426 = vmatpush.bf16.msra.mxu0 %v1322_v15 }
 0x142   :  { %v181_v60 = vsub.f32 %v180_v57, %v177_v59 }
 0x144   :  { %v186_v61 = vadd.f32 %v1372_v58, %v181_v60 }
 0x145   :  { %427 = vmatpush.bf16.msra.mxu0 %v1321_v18  ;;  %v526_v18 = vstv %s1809_s13  ;;  %s1417_s13 = smov 126  }
 0x146   :  { %v187_v62 = vpack.c.bf16 %v186_v61, %v186_v61 }
 0x148   :  { %264 = vmatmul.bf16.vlgmr.msrb.gmra.mxu2 %v187_v62 }
 0x149   :  { %428 = vmatpush.bf16.msra.mxu0 %v1320_v33  ;;  %701 = vmatpush.bf16.msrb.mxu2 %v1350_v1 }
 0x14d   :  { %429 = vmatpush.bf16.msra.mxu0 %v1319_v36  ;;  %702 = vmatpush.bf16.msrb.mxu2 %v1349_v2 }
 0x151   :  { %749 = vmatpush.msrb.mxu0 %v356_v0  ;;  %703 = vmatpush.bf16.msrb.mxu2 %v1348_v8 }
 0x155   :  { %704 = vmatpush.bf16.msrb.mxu2 %v1347_v9 }
 0x159   :  { %705 = vmatpush.bf16.msrb.mxu2 %v1346_v10 }
 0x15d   :  { %706 = vmatpush.bf16.msrb.mxu2 %v1345_v11 }
 0x161   :  { %707 = vmatpush.bf16.msrb.mxu2 %v1344_v12 }
 0x165   :  { %708 = vmatpush.bf16.msrb.mxu2 %v1343_v13 }
 0x1cb   :  { %v265_v22 = vpop.f32.mrf.mxu2 }
 0x1cc   :  { %v266_v23 = vadd.f32 %v1373_v19, %v265_v22  ;;  %v1375_v22 = vld [vmem:[%s1808_s12] ss:$0 sm:$0xff]  ;;  %s1416_s12 = smov 127  }
 0x1ce   :  { %v269_v26 = vmax.f32 %v266_v23, 0.0 }
 0x1d0   :  { %v270_v29 = vpack.c.bf16 %v269_v26, %v269_v26 }
 0x1d2   :  { %347 = vmatmul.bf16.vlgmr.msra.gmra.mxu3 %v270_v29 }
 0x1d3   :  { %v267_v31 = vpop.f32.mrf.mxu2  ;;  %903 = vmatpush.bf16.msra.mxu3 %v1366_v28 }
 0x1d7   :  { %904 = vmatpush.bf16.msra.mxu3 %v1365_v32 }
 0x1db   :  { %905 = vmatpush.bf16.msra.mxu3 %v1364_v35 }
 0x1df   :  { %906 = vmatpush.bf16.msra.mxu3 %v1363_v38 }
 0x1e3   :  { %907 = vmatpush.bf16.msra.mxu3 %v1362_v40 }
 0x1e7   :  { %908 = vmatpush.bf16.msra.mxu3 %v1361_v42 }
 0x1eb   :  { %909 = vmatpush.bf16.msra.mxu3 %v1360_v44 }
 0x1ef   :  { %910 = vmatpush.bf16.msra.mxu3 %v1359_v46 }
 0x255   :  { %v348_v48 = vpop.f32.mrf.mxu3 }
 0x256   :  { %v349_v49 = vadd.f32 %v1374_v47, %v348_v48 }
 0x258   :  { %v352_v50 = vmax.f32 %v349_v49, 0.0 }
 0x25a   :  { %v353_v51 = vpack.c.bf16 %v352_v50, %v352_v50 }
 0x25c   :  { %430 = vmatmul.bf16.vlgmr.msra.gmra.mxu0 %v353_v51  ;;  %507 = vmatmul.bf16.vlgmr.msrb.gmra.mxu1 %v353_v51 }
 0x25d   :  { %631 = vmatmul.bf16.vlgmr.msrb.gmra.mxu3 %v353_v51  ;;  %v350_v52 = vpop.f32.mrf.mxu3  ;;  %951 = vmatpush.msra.mxu0 %v356_v0 }
 0x26c   :  { %833 = vmatmul.bf16.vlgmr.msra.gmra.mxu1 %v353_v51 }
 0x26d   :  { %911 = vmatmul.bf16.vlgmr.msra.gmra.mxu3 %v353_v51 }
 0x2d9   :  { %v431_v53 = vpop.f32.mrf.mxu0  ;;  %v508_v54 = vpop.f32.mrf.mxu1 }
 0x2da   :  { %v513_v55 = vsel %vm512_vm5, %v508_v54, -inf }
 0x2db   :  { %514 = vmax.xlane.f32.xlu0 %v513_v55 }
 0x2e0   :  { %v1743_v56 = vpop.f32.mrf.mxu3 }
 0x2e1   :  { %v433_v57 = vpop.f32.mrf.mxu0  ;;  %v510_v58 = vpop.f32.mrf.mxu1 }
 0x2e8   :  { %v634_v59 = vpop.f32.mrf.mxu3 }
 0x2e9   :  { %v1745_v60 = vpop.f32.mrf.mxu1 }
 0x2f0   :  { %v912_v61 = vpop.f32.mrf.mxu3 }
 0x2f1   :  { %v836_v62 = vpop.f32.mrf.mxu1  ;;  %v916_v28 = vsel %vm512_vm5, %v912_v61, -inf }
 0x2f8   :  { %v914_v63 = vpop.f32.mrf.mxu3 }
 0x34e   :  { %v515_v3 = vpop.xlane.xlu0 %514 }
 0x34f   :  { %v516_v4 = vsub.f32 %v508_v54, %v515_v3 }
 0x351   :  { %v517_v5 = vmul.f32 1.442695, %v516_v4 }
 0x353   :  { %1378 = vpow2.f32 %v517_v5 }
 0x359   :  { %v1379_v6 = vpop.eup %1378 }
 0x35a   :  { %v519_v7 = vsel %vm512_vm5, %v1379_v6, 0.0 }
 0x35b   :  { %520 = vadd.xlane.f32.xlu0 %v519_v7 }
 0x36f   :  { %728 = vrot.lane.b32.xlu0 %v1375_v22, %s1416_s12 }
 0x3ce   :  { %v521_v14 = vpop.xlane.xlu0 %520 }
 0x3cf   :  { %1380 = vrcp.f32 %v521_v14 }
 0x3d5   :  { %v1381_v15 = vpop.eup %1380 }
 0x3d6   :  { %v523_v17 = vmul.f32 %v1381_v15, %v1379_v6 }
 0x3d8   :  { %v525_v19 = vmul.f32 %v524_v16, %v523_v17 }
 0x3da   :  { %v527_v20 = vadd.f32 %v526_v18, %v525_v19 }
 0x3dc   :  { %v528_v21 = vmul.f32 %v527_v20, %v431_v53 }
 0x3de   :  { %1108 = vmatmul.msk.f32.vlgmr.msra.gmra.mxu2 %vm532_vm6, %v528_v21 }
 0x3e6   :  { %709 = vmatmul.bf16.vlgmr.msrb.gmra.mxu2 %v353_v51  ;;  %v729_v51 = vpop.permute.xlu0 %728 }
 0x461   :  { %v553_v23 = vpop.f32.mrf.mxu2 }
 0x462   :  { %v554_v24 = vadd.f32 %v1375_v22, %v553_v23 }
 0x464   :  { %557 = vst.msk [vmem:[#allocation3] sm:$0x3] %vm556_vm7, %v554_v24 }
 0x469   :  { %v710_v25 = vpop.f32.mrf.mxu2 }
 0x46a   :  { %v714_v26 = vsel %vm512_vm5, %v710_v25, -inf }
 0x46b   :  { %715 = vmax.xlane.f32.xlu1 %v714_v26 }
 0x471   :  { %v712_v27 = vpop.f32.mrf.mxu2 }
 0x473   :  { %917 = vmax.xlane.f32.xlu1 %v916_v28 }
 0x48c   :  { %930 = vrot.lane.b32.xlu1 %v1375_v22, %s1417_s13 }
 0x4de   :  { %v716_v29 = vpop.xlane.xlu1 %715 }
 0x4df   :  { %v717_v30 = vsub.f32 %v710_v25, %v716_v29 }
 0x4e1   :  { %v718_v31 = vmul.f32 1.442695, %v717_v30 }
 0x4e3   :  { %1382 = vpow2.f32 %v718_v31 }
 0x4e6   :  { %v918_v32 = vpop.xlane.xlu1 %917 }
 0x4e7   :  { %v919_v33 = vsub.f32 %v912_v61, %v918_v32 }
 0x4e9   :  { %v1383_v34 = vpop.eup %1382  ;;  %v920_v35 = vmul.f32 1.442695, %v919_v33 }
 0x4ea   :  { %v720_v36 = vsel %vm512_vm5, %v1383_v34, 0.0 }
 0x4eb   :  { %1384 = vpow2.f32 %v920_v35  ;;  %721 = vadd.xlane.f32.xlu2 %v720_v36 }
 0x4f1   :  { %v1385_v37 = vpop.eup %1384 }
 0x4f2   :  { %v922_v38 = vsel %vm512_vm5, %v1385_v37, 0.0 }
 0x4f3   :  { %923 = vadd.xlane.f32.xlu2 %v922_v38 }
 0x4fe   :  { %v931_v54 = vpop.permute.xlu1 %930 }
 0x55e   :  { %v722_v39 = vpop.xlane.xlu2 %721 }
 0x55f   :  { %1386 = vrcp.f32 %v722_v39 }
 0x565   :  { %v1387_v40 = vpop.eup %1386 }
 0x566   :  { %v724_v41 = vmul.f32 %v1387_v40, %v1383_v34  ;;  %v924_v42 = vpop.xlane.xlu2 %923 }
 0x567   :  { %1388 = vrcp.f32 %v924_v42 }
 0x568   :  { %v725_v43 = vmul.f32 %v724_v41, %v524_v16 }
 0x56a   :  { %v726_v44 = vadd.f32 %v725_v43, %v526_v18 }
 0x56c   :  { %v727_v45 = vmul.f32 %v726_v44, %v1743_v56 }
 0x56d   :  { %v1389_v46 = vpop.eup %1388 }
 0x56e   :  { %v926_v47 = vmul.f32 %v1389_v46, %v1385_v37  ;;  %1205 = vmatmul.msk.f32.vlgmr.msrb.gmra.mxu0 %vm532_vm6, %v727_v45 }
 0x570   :  { %v927_v48 = vmul.f32 %v926_v47, %v524_v16 }
 0x572   :  { %v928_v49 = vadd.f32 %v927_v48, %v526_v18 }
 0x574   :  { %v929_v50 = vmul.f32 %v928_v49, %v1745_v60 }
 0x576   :  { %1302 = vmatmul.msk.f32.vlgmr.msra.gmra.mxu0 %vm532_vm6, %v929_v50 }
 0x5eb   :  { %v751_v52 = vpop.f32.mrf.mxu0 }
 0x5ec   :  { %v752_v53 = vadd.f32 %v751_v52, %v729_v51 }
 0x5ee   :  { %755 = vrot.lane.b32.xlu2 %v752_v53, %s1418_s22 }
 0x5f3   :  { %v953_v55 = vpop.f32.mrf.mxu0 }
 0x5f4   :  { %v954_v57 = vadd.f32 %v953_v55, %v931_v54 }
 0x5f6   :  { %957 = vrot.lane.b32.xlu0 %v954_v57, %s1419_s23 }
 0x648   :  { %v756_v56 = vpop.permute.xlu2 %755 }
 0x649   :  { %759 = vst.msk [vmem:[#allocation3] sm:$0x3] %vm758_vm8, %v756_v56 }
 0x668   :  { %v958_v58 = vpop.permute.xlu0 %957 }
 0x669   :  { %961 = vst.msk [vmem:[#allocation3] sm:$0x3] %vm960_vm9, %v958_v58 }
 0x66a   :  { %972 = dma.vmem_to_hbm [thread:$0]  %s968_s8, 32, %s970_s2, [#allocation4]  }
 0x66b   :  { %1414 = dma.done.wait [#allocation4], 32  }
 0x66c   :  { %1415 = vsyncadd [#allocation4], 4294967264 }
 0x66d   :  { %977 = vsyncpa [#allocation4], 1 }

</bundles_post_ra>
